<compile_context>
chip_gen: v7x
topology: tpu7x:2x2x1
jax: 0.10.0
libtpu: 0.0.40
codegen_flags: <defaults>
</compile_context>

<pallas_src>
import functools

import jax
import jax.numpy as jnp
from jax.experimental import pallas as pl
from jax.experimental.pallas import tpu as pltpu

_COS_EPS = 1e-8  # F.cosine_similarity default eps


def _mean_to_1x1(x):
    """Mean over all elements, kept as a (1, 1) array (no vector->scalar round trip)."""
    s = jnp.sum(x, axis=-1, keepdims=True)                               # lane reduce
    s = jnp.sum(s, axis=tuple(range(s.ndim - 1)), keepdims=True)         # collapse rest
    return s.reshape(1, 1) * (1.0 / x.size)


def _multitask_loss_kernel(dec_ref, tgt_ref, p_ref, tp_ref, mf_ref, tmf_ref,
                           scalars_ref, out_ref,
                           *, w_rec, w_pitch, w_mfcc, w_commit, w_perp):
    f32 = jnp.float32

    # ---- reconstruction MSE (dominant term; sublane-full lane-dense tiles) --
    d = dec_ref[...].astype(f32) - tgt_ref[...].astype(f32)
    rec = _mean_to_1x1(d * d)                                            # (1, 1)

    # ---- pitch: 1 - mean(cosine_similarity(., ., dim=1)) --------------------
    # Reduction axis (PyTorch dim=1, length C, typically 2) is unrolled as C
    # static sublane slices: pure VALU multiply-adds, no transpose / XLU reduce.
    C = p_ref.shape[1]
    dot = nsq1 = nsq2 = None
    for c in range(C):
        pc = p_ref[:, c:c + 1, :].astype(f32)                            # (B, 1, M)
        tc = tp_ref[:, c:c + 1, :].astype(f32)                           # (B, 1, M)
        if c == 0:
            dot, nsq1, nsq2 = pc * tc, pc * pc, tc * tc
        else:
            dot = dot + pc * tc
            nsq1 = nsq1 + pc * pc
            nsq2 = nsq2 + tc * tc
    # PyTorch: denom = sqrt(clamp_min(||x1||^2 * ||x2||^2, eps^2)) = max(||x1||*||x2||, eps)
    denom = jnp.maximum(jnp.sqrt(nsq1 * nsq2), _COS_EPS)
    cos = dot / denom                                                    # (B, 1, M)
    pitch = 1.0 - _mean_to_1x1(cos)                                      # (1, 1)

    # ---- mfcc MSE -----------------------------------------------------------
    m = mf_ref[...].astype(f32) - tmf_ref[...].astype(f32)
    mfcc = _mean_to_1x1(m * m)                                           # (1, 1)

    # ---- weighted combine; commit / perplexity come in as SMEM scalars ------
    commit = scalars_ref[0]
    perp = scalars_ref[1]
    total = (w_rec * rec + w_pitch * pitch + w_mfcc * mfcc
             + w_commit * commit + w_perp * perp)
    out_ref[...] = total.astype(out_ref.dtype)


def _sublane_full_2d(x):
    """Contiguous (free) reshape to a sublane-full, lane-dense 2-D view."""
    n = x.size
    rows = 8 if (n % 8 == 0) else 1
    return x.reshape(rows, n // rows)


def multitask_loss(decoded_output, target, pitch_output, target_pitch,
                   mfcc_output, target_mfcc, commit_loss, perplexity_loss,
                   *, weight_reconstruction=1.0, weight_pitch=0.3,
                   weight_mfcc=0.3, weight_commit=0.2, weight_perplexity=0.2):
    """Fused TPU forward of MultiTaskLoss. Returns a scalar (0-d) f32 array."""
    f32 = jnp.float32

    # MSE terms: free contiguous reshape to (8, N/8) — one HBM read each, no casts.
    dec2 = _sublane_full_2d(decoded_output)
    tgt2 = _sublane_full_2d(target)
    mf2 = _sublane_full_2d(mfcc_output)
    tmf2 = _sublane_full_2d(target_mfcc)

    # Pitch tensors stay in native layout; dim=1 reduce happens in-kernel.
    if pitch_output.ndim == 2:           # (B, C) -> (B, C, 1), free reshape
        pitch_output = pitch_output[:, :, None]
        target_pitch = target_pitch[:, :, None]

    # Loose scalar losses ride in a single (2,) SMEM operand.
    scalars = jnp.stack([jnp.asarray(commit_loss, f32).reshape(()),
                         jnp.asarray(perplexity_loss, f32).reshape(())])

    kernel = functools.partial(
        _multitask_loss_kernel,
        w_rec=float(weight_reconstruction), w_pitch=float(weight_pitch),
        w_mfcc=float(weight_mfcc), w_commit=float(weight_commit),
        w_perp=float(weight_perplexity))

    operands = (dec2, tgt2, pitch_output, target_pitch, mf2, tmf2, scalars)
    n_pitch_lanes = pitch_output.size // pitch_output.shape[1]           # B * M
    bytes_accessed = sum(int(o.size) * o.dtype.itemsize for o in operands) + 4
    cost = pl.CostEstimate(
        flops=int(5 * (dec2.size + mf2.size + pitch_output.size) + 10 * n_pitch_lanes),
        transcendentals=int(2 * n_pitch_lanes),
        bytes_accessed=int(bytes_accessed))

    vmem = pltpu.MemorySpace.VMEM
    smem = pltpu.MemorySpace.SMEM
    out = pl.pallas_call(
        kernel,
        out_shape=jax.ShapeDtypeStruct((1, 1), f32),
        in_specs=[pl.BlockSpec(memory_space=vmem)] * 6
                 + [pl.BlockSpec(memory_space=smem)],
        out_specs=pl.BlockSpec(memory_space=vmem),
        cost_estimate=cost,
        # NOTE: no vmem_limit_bytes override — default scoped limit is legal on
        # v5e/v6e/v7x and far exceeds the ~16 KB these inputs need.
    )(*operands)

    return out[0, 0]


def _reference_loss(decoded, target, pitch_out, target_pitch,
                    mfcc_out, target_mfcc, commit_loss, perplexity_loss,
                    w_rec=1.0, w_pitch=0.3, w_mfcc=0.3, w_commit=0.2, w_perp=0.2):
    """Pure-JAX reference matching the PyTorch module."""
    rec = jnp.mean((decoded - target) ** 2)
    dot = jnp.sum(pitch_out * target_pitch, axis=1)
    nsq1 = jnp.sum(pitch_out * pitch_out, axis=1)
    nsq2 = jnp.sum(target_pitch * target_pitch, axis=1)
    cos = dot / jnp.maximum(jnp.sqrt(nsq1 * nsq2), _COS_EPS)   # PyTorch eps semantics
    pitch = 1.0 - jnp.mean(cos)
    mfcc = jnp.mean((mfcc_out - target_mfcc) ** 2)
    return (w_rec * rec + w_pitch * pitch + w_mfcc * mfcc
            + w_commit * commit_loss + w_perp * perplexity_loss)


if __name__ == "__main__":
    key = jax.random.PRNGKey(0)
    ks = jax.random.split(key, 8)

    B = 2
    decoded = jax.random.normal(ks[0], (B, 1, 64, 43), jnp.float32)
    target = jax.random.normal(ks[1], (B, 1, 64, 43), jnp.float32)
    pitch_out = jax.random.normal(ks[2], (B, 2, 185), jnp.float32)   # PitchDecoder output
    target_pitch = jax.random.normal(ks[3], (B, 2, 185), jnp.float32)
    mfcc_out = jax.random.normal(ks[4], (B, 20, 43), jnp.float32)
    target_mfcc = jax.random.normal(ks[5], (B, 20, 43), jnp.float32)
    commit_loss = jnp.abs(jax.random.normal(ks[6], (), jnp.float32))
    perplexity_loss = jnp.abs(jax.random.normal(ks[7], (), jnp.float32))

    total = multitask_loss(decoded, target, pitch_out, target_pitch,
                           mfcc_out, target_mfcc, commit_loss, perplexity_loss)
    total = jax.block_until_ready(total)
    assert total.shape == (), total.shape

    ref = jax.block_until_ready(
        _reference_loss(decoded, target, pitch_out, target_pitch,
                        mfcc_out, target_mfcc, commit_loss, perplexity_loss))
    assert jnp.allclose(total, ref, rtol=1e-4, atol=1e-4), (float(total), float(ref))

    print("KERNEL_OK")
</pallas_src>

<mosaic_0001>
module attributes {stable_mosaic.version = 11 : i64} {
  func.func @_multitask_loss_kernel(%arg0: memref<8x688xf32, #tpu.memory_space<vmem>>, %arg1: memref<8x688xf32, #tpu.memory_space<vmem>>, %arg2: memref<2x2x185xf32, #tpu.memory_space<vmem>>, %arg3: memref<2x2x185xf32, #tpu.memory_space<vmem>>, %arg4: memref<8x215xf32, #tpu.memory_space<vmem>>, %arg5: memref<8x215xf32, #tpu.memory_space<vmem>>, %arg6: memref<2xf32, #tpu.memory_space<smem>>, %arg7: memref<1x1xf32, #tpu.memory_space<vmem>>) attributes {dimension_semantics = [], scalar_prefetch = 0 : i64, scratch_operands = 0 : i64, tpu.core_type = #tpu.core_type<tc>} {
    %c0 = arith.constant 0 : index
    %c0_0 = arith.constant 0 : index
    %0 = vector.load %arg0[%c0, %c0_0] : memref<8x688xf32, #tpu.memory_space<vmem>>, vector<8x688xf32>
    %c0_1 = arith.constant 0 : index
    %c0_2 = arith.constant 0 : index
    %1 = vector.load %arg1[%c0_1, %c0_2] : memref<8x688xf32, #tpu.memory_space<vmem>>, vector<8x688xf32>
    %2 = arith.subf %0, %1 : vector<8x688xf32>
    %3 = arith.mulf %2, %2 : vector<8x688xf32>
    %cst = arith.constant dense<0.000000e+00> : vector<8xf32>
    %4 = vector.multi_reduction <add>, %3, %cst [1] : vector<8x688xf32> to vector<8xf32>
    %5 = vector.shape_cast %4 : vector<8xf32> to vector<8x1xf32>
    %cst_3 = arith.constant dense<0.000000e+00> : vector<1xf32>
    %6 = vector.multi_reduction <add>, %5, %cst_3 [0] : vector<8x1xf32> to vector<1xf32>
    %7 = vector.shape_cast %6 : vector<1xf32> to vector<1x1xf32>
    %cst_4 = arith.constant 1.81686046E-4 : f32
    %8 = vector.broadcast %cst_4 : f32 to vector<1x1xf32>
    %9 = arith.mulf %7, %8 : vector<1x1xf32>
    %c0_5 = arith.constant 0 : index
    %c0_6 = arith.constant 0 : index
    %c0_7 = arith.constant 0 : index
    %10 = vector.load %arg2[%c0_5, %c0_6, %c0_7] : memref<2x2x185xf32, #tpu.memory_space<vmem>>, vector<2x1x185xf32>
    %c0_8 = arith.constant 0 : index
    %c0_9 = arith.constant 0 : index
    %c0_10 = arith.constant 0 : index
    %11 = vector.load %arg3[%c0_8, %c0_9, %c0_10] : memref<2x2x185xf32, #tpu.memory_space<vmem>>, vector<2x1x185xf32>
    %12 = arith.mulf %10, %11 : vector<2x1x185xf32>
    %13 = arith.mulf %10, %10 : vector<2x1x185xf32>
    %14 = arith.mulf %11, %11 : vector<2x1x185xf32>
    %c0_11 = arith.constant 0 : index
    %c1 = arith.constant 1 : index
    %c0_12 = arith.constant 0 : index
    %15 = vector.load %arg2[%c0_11, %c1, %c0_12] : memref<2x2x185xf32, #tpu.memory_space<vmem>>, vector<2x1x185xf32>
    %c0_13 = arith.constant 0 : index
    %c1_14 = arith.constant 1 : index
    %c0_15 = arith.constant 0 : index
    %16 = vector.load %arg3[%c0_13, %c1_14, %c0_15] : memref<2x2x185xf32, #tpu.memory_space<vmem>>, vector<2x1x185xf32>
    %17 = arith.mulf %15, %16 : vector<2x1x185xf32>
    %18 = arith.addf %12, %17 : vector<2x1x185xf32>
    %19 = arith.mulf %15, %15 : vector<2x1x185xf32>
    %20 = arith.addf %13, %19 : vector<2x1x185xf32>
    %21 = arith.mulf %16, %16 : vector<2x1x185xf32>
    %22 = arith.addf %14, %21 : vector<2x1x185xf32>
    %23 = arith.mulf %20, %22 : vector<2x1x185xf32>
    %24 = math.sqrt %23 : vector<2x1x185xf32>
    %cst_16 = arith.constant 9.99999993E-9 : f32
    %25 = vector.broadcast %cst_16 : f32 to vector<2x1x185xf32>
    %26 = arith.maximumf %24, %25 : vector<2x1x185xf32>
    %27 = arith.divf %18, %26 : vector<2x1x185xf32>
    %cst_17 = arith.constant dense<0.000000e+00> : vector<2x1xf32>
    %28 = vector.multi_reduction <add>, %27, %cst_17 [2] : vector<2x1x185xf32> to vector<2x1xf32>
    %29 = vector.shape_cast %28 : vector<2x1xf32> to vector<2x1x1xf32>
    %cst_18 = arith.constant dense<0.000000e+00> : vector<1xf32>
    %30 = vector.multi_reduction <add>, %29, %cst_18 [0, 1] : vector<2x1x1xf32> to vector<1xf32>
    %31 = vector.shape_cast %30 : vector<1xf32> to vector<1x1x1xf32>
    %32 = vector.shape_cast %31 : vector<1x1x1xf32> to vector<1x1xf32>
    %cst_19 = arith.constant 0.00270270277 : f32
    %33 = vector.broadcast %cst_19 : f32 to vector<1x1xf32>
    %34 = arith.mulf %32, %33 : vector<1x1xf32>
    %cst_20 = arith.constant 1.000000e+00 : f32
    %35 = vector.broadcast %cst_20 : f32 to vector<1x1xf32>
    %36 = arith.subf %35, %34 : vector<1x1xf32>
    %c0_21 = arith.constant 0 : index
    %c0_22 = arith.constant 0 : index
    %37 = vector.load %arg4[%c0_21, %c0_22] : memref<8x215xf32, #tpu.memory_space<vmem>>, vector<8x215xf32>
    %c0_23 = arith.constant 0 : index
    %c0_24 = arith.constant 0 : index
    %38 = vector.load %arg5[%c0_23, %c0_24] : memref<8x215xf32, #tpu.memory_space<vmem>>, vector<8x215xf32>
    %39 = arith.subf %37, %38 : vector<8x215xf32>
    %40 = arith.mulf %39, %39 : vector<8x215xf32>
    %cst_25 = arith.constant dense<0.000000e+00> : vector<8xf32>
    %41 = vector.multi_reduction <add>, %40, %cst_25 [1] : vector<8x215xf32> to vector<8xf32>
    %42 = vector.shape_cast %41 : vector<8xf32> to vector<8x1xf32>
    %cst_26 = arith.constant dense<0.000000e+00> : vector<1xf32>
    %43 = vector.multi_reduction <add>, %42, %cst_26 [0] : vector<8x1xf32> to vector<1xf32>
    %44 = vector.shape_cast %43 : vector<1xf32> to vector<1x1xf32>
    %cst_27 = arith.constant 5.81395347E-4 : f32
    %45 = vector.broadcast %cst_27 : f32 to vector<1x1xf32>
    %46 = arith.mulf %44, %45 : vector<1x1xf32>
    %c0_28 = arith.constant 0 : index
    %47 = memref.load %arg6[%c0_28] : memref<2xf32, #tpu.memory_space<smem>>
    %c1_29 = arith.constant 1 : index
    %48 = memref.load %arg6[%c1_29] : memref<2xf32, #tpu.memory_space<smem>>
    %cst_30 = arith.constant 1.000000e+00 : f32
    %49 = vector.broadcast %cst_30 : f32 to vector<1x1xf32>
    %50 = arith.mulf %49, %9 : vector<1x1xf32>
    %cst_31 = arith.constant 3.000000e-01 : f32
    %51 = vector.broadcast %cst_31 : f32 to vector<1x1xf32>
    %52 = arith.mulf %51, %36 : vector<1x1xf32>
    %53 = arith.addf %50, %52 : vector<1x1xf32>
    %cst_32 = arith.constant 3.000000e-01 : f32
    %54 = vector.broadcast %cst_32 : f32 to vector<1x1xf32>
    %55 = arith.mulf %54, %46 : vector<1x1xf32>
    %56 = arith.addf %53, %55 : vector<1x1xf32>
    %cst_33 = arith.constant 2.000000e-01 : f32
    %57 = arith.mulf %cst_33, %47 : f32
    %58 = vector.broadcast %57 : f32 to vector<1x1xf32>
    %59 = arith.addf %56, %58 : vector<1x1xf32>
    %cst_34 = arith.constant 2.000000e-01 : f32
    %60 = arith.mulf %cst_34, %48 : f32
    %61 = vector.broadcast %60 : f32 to vector<1x1xf32>
    %62 = arith.addf %59, %61 : vector<1x1xf32>
    %c0_35 = arith.constant 0 : index
    %c0_36 = arith.constant 0 : index
    %63 = vector.load %arg7[%c0_35, %c0_36] : memref<1x1xf32, #tpu.memory_space<vmem>>, vector<1x1xf32>
    tpu.vector_store %arg7[%c0_35, %c0_36], %62 {strides = array<i32>} : memref<1x1xf32, #tpu.memory_space<vmem>>, vector<1x1xf32>,
    return
  }
}

</mosaic_0001>

<bundles_post_ra>
// kernel: tpu_custom_call.1
= control target key start
LH: loop header
LB: loop body
LE: loop exit
PB: predicated region body
PF: predicated region fallthrough
CT: control target
= control target key end

     0   :  { %12 = vsyncpa [#allocation3], 0  ;;  %s641_s0 = inlined_call_operand.hbm [shape: f32[8,688], index: 0, kind: input, shape index: {}]   ;;  %s642_s1 = inlined_call_operand.hbm [shape: f32[8,688], index: 1, kind: input, shape index: {}]   ;;  %s643_s2 = inlined_call_operand.hbm [shape: f32[2,2,185], index: 2, kind: input, shape index: {}]   ;;  %s644_s3 = inlined_call_operand.hbm [shape: f32[2,2,185], index: 3, kind: input, shape index: {}]   ;;  %s645_s4 = inlined_call_operand.hbm [shape: f32[8,215], index: 4, kind: input, shape index: {}]   ;;  %s646_s5 = inlined_call_operand.vmem [shape: f32[8,215], index: 5, kind: input, shape index: {}]   ;;  %s647_s6 = inlined_call_operand.vmem [shape: f32[2], index: 6, kind: input, shape index: {}]   ;;  %s648_s7 = inlined_call_operand.hbm [shape: f32[1,1], index: 7, kind: output, shape index: {}]  }
   0x1   :  { %13 = vsyncpa [#allocation7], 0 }
   0x2   :  { %14 = vsyncpa [#allocation10], 0 }
   0x3   :  { %15 = vsyncpa [#allocation5], 0 }
   0x4   :  { %16 = vsyncpa [#allocation4], 0  ;;  %s465_s24 = smov [#allocation6]   ;;  %s311_s28 = scalar_lea.hbm %s642_s1, 768 }
   0x5   :  { %s33_s25 = sshll.u32 %s465_s24, 4  ;;  %p312_p0 = scmp.ne.s32.totalorder %s642_s1, %s311_s28  ;;  %s34_s25 = int_to_ptr.vmem [resolvable:$true] %s33_s25 }
   0x6   :  { %p315_p1 = scmp.lt.u32.totalorder %s311_s28, %s642_s1 }
   0x8   :  { %p317_p2 = pnand %p315_p1, %p312_p0 }
   0xa   :  { %320 = shalt.err (!%p317_p2)
}
   0xb   :  { %s321_s10 = scalar_lea.vmem %s34_s25, 768  ;;  %p326_p4 = scmp.lt.s32.totalorder %s34_s25, %s34_s25 }
   0xc   :  { %p322_p3 = scmp.ne.s32.totalorder %s34_s25, %s321_s10  ;;  %p327_p5 = scmp.lt.s32.totalorder %s321_s10, %s321_s10 }
   0xe   :  { %p328_p6 = por %p327_p5, %p326_p4 }
  0x10   :  { %p329_p7 = pnand %p328_p6, %p322_p3 }
  0x12   :  { %332 = shalt.err (!%p329_p7)
}
  0x13   :  { %36 = dma.hbm_to_vmem [thread:$0]  %s642_s1, 768, %s34_s25, [#allocation7]  }
  0x14   :  { %s466_s13 = smov [#allocation9]   ;;  %s467_s15 = smov [#allocation2]  }
  0x15   :  { %s54_s14 = sshll.u32 %s466_s13, 4  ;;  %s23_s16 = sshll.u32 %s467_s15, 4  ;;  %s55_s14 = int_to_ptr.vmem [resolvable:$true] %s54_s14  ;;  %s24_s16 = int_to_ptr.vmem [resolvable:$true] %s23_s16 }
  0x16   :  { %s333_s19 = scalar_lea.hbm %s644_s3, 128 }
  0x17   :  { %p334_p8 = scmp.ne.s32.totalorder %s644_s3, %s333_s19  ;;  %p337_p9 = scmp.lt.u32.totalorder %s333_s19, %s644_s3 }
  0x19   :  { %p339_p10 = pnand %p337_p9, %p334_p8 }
  0x1b   :  { %342 = shalt.err (!%p339_p10)
}
  0x1c   :  { %s343_s1 = scalar_lea.vmem %s55_s14, 128  ;;  %p348_p12 = scmp.lt.s32.totalorder %s55_s14, %s55_s14 }
  0x1d   :  { %p344_p11 = scmp.ne.s32.totalorder %s55_s14, %s343_s1  ;;  %p349_p13 = scmp.lt.s32.totalorder %s343_s1, %s343_s1 }
  0x1f   :  { %p350_p0 = por %p349_p13, %p348_p12 }
  0x21   :  { %p351_p1 = pnand %p350_p0, %p344_p11 }
  0x23   :  { %354 = shalt.err (!%p351_p1)
}
  0x24   :  { %s468_s24 = smov 64   ;;  %s469_s25 = smov 4  }
  0x25   :  { %60 = dma.hbm_to_vmem [thread:$0]  %s644_s3, 128, %s55_s14, [#allocation10], %s468_s24, %s468_s24, %s469_s25  }
  0x26   :  { %s355_s30 = scalar_lea.hbm %s641_s0, 768 }
  0x27   :  { %p356_p2 = scmp.ne.s32.totalorder %s641_s0, %s355_s30  ;;  %p359_p3 = scmp.lt.u32.totalorder %s355_s30, %s641_s0 }
  0x29   :  { %p361_p4 = pnand %p359_p3, %p356_p2 }
  0x2b   :  { %364 = shalt.err (!%p361_p4)
}
  0x2c   :  { %s365_s12 = scalar_lea.vmem %s24_s16, 768  ;;  %p370_p6 = scmp.lt.s32.totalorder %s24_s16, %s24_s16 }
  0x2d   :  { %p366_p5 = scmp.ne.s32.totalorder %s24_s16, %s365_s12  ;;  %p371_p7 = scmp.lt.s32.totalorder %s365_s12, %s365_s12 }
  0x2f   :  { %p372_p8 = por %p371_p7, %p370_p6 }
  0x31   :  { %p373_p9 = pnand %p372_p8, %p366_p5 }
  0x33   :  { %376 = shalt.err (!%p373_p9)
}
  0x34   :  { %26 = dma.hbm_to_vmem [thread:$0]  %s641_s0, 768, %s24_s16, [#allocation3]  }
  0x35   :  { %s470_s14 = smov [#allocation8]   ;;  %s471_s17 = smov [#allocation11]  }
  0x36   :  { %s42_s15 = sshll.u32 %s470_s14, 4  ;;  %s67_s18 = sshll.u32 %s471_s17, 4  ;;  %s43_s15 = int_to_ptr.vmem [resolvable:$true] %s42_s15  ;;  %s68_s18 = int_to_ptr.vmem [resolvable:$true] %s67_s18 }
  0x37   :  { %s377_s21 = scalar_lea.hbm %s643_s2, 128 }
  0x38   :  { %p378_p10 = scmp.ne.s32.totalorder %s643_s2, %s377_s21  ;;  %p381_p11 = scmp.lt.u32.totalorder %s377_s21, %s643_s2 }
  0x3a   :  { %p383_p12 = pnand %p381_p11, %p378_p10 }
  0x3c   :  { %386 = shalt.err (!%p383_p12)
}
  0x3d   :  { %s387_s0 = scalar_lea.vmem %s43_s15, 128  ;;  %p392_p0 = scmp.lt.s32.totalorder %s43_s15, %s43_s15 }
  0x3e   :  { %p388_p13 = scmp.ne.s32.totalorder %s43_s15, %s387_s0  ;;  %p393_p1 = scmp.lt.s32.totalorder %s387_s0, %s387_s0 }
  0x40   :  { %p394_p2 = por %p393_p1, %p392_p0 }
  0x42   :  { %p395_p3 = pnand %p394_p2, %p388_p13 }
  0x44   :  { %398 = shalt.err (!%p395_p3)
}
  0x45   :  { %48 = dma.hbm_to_vmem [thread:$0]  %s643_s2, 128, %s43_s15, [#allocation7], %s468_s24, %s468_s24, %s469_s25  }
  0x46   :  { %s79_s30 = sshll.u32 %s647_s6, 4  ;;  %s399_s10 = scalar_lea.hbm %s645_s4, 256  ;;  %s80_s30 = int_to_ptr.vmem [resolvable:$true] %s79_s30 }
  0x47   :  { %p400_p4 = scmp.ne.s32.totalorder %s645_s4, %s399_s10  ;;  %p403_p5 = scmp.lt.u32.totalorder %s399_s10, %s645_s4 }
  0x49   :  { %p405_p6 = pnand %p403_p5, %p400_p4 }
  0x4b   :  { %408 = shalt.err (!%p405_p6)
}
  0x4c   :  { %s409_s2 = scalar_lea.vmem %s68_s18, 256  ;;  %p414_p8 = scmp.lt.s32.totalorder %s68_s18, %s68_s18 }
  0x4d   :  { %p410_p7 = scmp.ne.s32.totalorder %s68_s18, %s409_s2  ;;  %p415_p9 = scmp.lt.s32.totalorder %s409_s2, %s409_s2 }
  0x4f   :  { %p416_p10 = por %p415_p9, %p414_p8 }
  0x51   :  { %p417_p11 = pnand %p416_p10, %p410_p7 }
  0x53   :  { %420 = shalt.err (!%p417_p11)
}
  0x54   :  { %70 = dma.hbm_to_vmem [thread:$0]  %s645_s4, 256, %s68_s18, [#allocation10]  }
  0x55   :  { %s421_s25 = scalar_lea.vmem %s80_s30, 16  ;;  %p426_p13 = scmp.lt.s32.totalorder %s80_s30, %s80_s30 }
  0x56   :  { %p422_p12 = scmp.ne.s32.totalorder %s80_s30, %s421_s25  ;;  %p427_p0 = scmp.lt.s32.totalorder %s421_s25, %s421_s25 }
  0x58   :  { %p428_p1 = por %p427_p0, %p426_p13 }
  0x5a   :  { %p429_p2 = pnand %p428_p1, %p422_p12 }
  0x5c   :  { %432 = shalt.err (!%p429_p2)
}
  0x5d   :  { %s472_s14 = smov [#allocation12]  }
  0x5e   :  { %82 = dma.vmem_to_smem %s80_s30, 16, %s472_s14, [#allocation5]  }
  0x5f   :  { %455 = dma.done.wait [#allocation3], 768  }
  0x60   :  { %456 = vsyncadd [#allocation3], 4294966528 }
  0x61   :  { %457 = dma.done.wait [#allocation7], 896  }
  0x62   :  { %458 = vsyncadd [#allocation7], 4294966400 }
  0x63   :  { %459 = dma.done.wait [#allocation10], 384  }
  0x64   :  { %460 = vsyncadd [#allocation10], 4294966912 }
  0x65   :  { %461 = dma.done.wait [#allocation5], 16  }
  0x66   :  { %462 = vsyncadd [#allocation5], 4294967280 }
  0x67   :  { %101 = sfence }
  0x68   :  { %v583_v0 = vld [vmem:[#allocation8] ss:$2 sm:$0x3]  ;;  %v585_v1 = vld [vmem:[#allocation9] ss:$2 sm:$0x3] }
  0x69   :  { %v150_v2 = vmul.f32 %v583_v0, %v583_v0  ;;  %v152_v3 = vmul.f32 %v585_v1, %v585_v1  ;;  %v591_v4 = vld [vmem:[#allocation8 + $0x1] ss:$2 sm:$0x3]  ;;  %v593_v5 = vld [vmem:[#allocation9 + $0x1] ss:$2 sm:$0x3] }
  0x6a   :  { %v166_v6 = vmul.f32 %v591_v4, %v591_v4  ;;  %v170_v7 = vmul.f32 %v593_v5, %v593_v5  ;;  %v102_v8 = vld [vmem:[#allocation2] sm:$0xff]  ;;  %v103_v9 = vld [vmem:[#allocation2 + $0x8] sm:$0xff]  ;;  %v104_v10 = vld [vmem:[#allocation2 + $0x10] sm:$0xff]  ;;  %vm130_vm0 = vcmask 392192   ;;  %vm249_vm1 = vcmask 711680   ;;  %s293_s19 = sld [smem:[#allocation12 + $0x1]] }
  0x6b   :  { %v105_v11 = vld [vmem:[#allocation2 + $0x18] sm:$0xff]  ;;  %v106_v12 = vld [vmem:[#allocation2 + $0x20] sm:$0xff]  ;;  %v107_v13 = vld [vmem:[#allocation2 + $0x28] sm:$0xff]  ;;  %vm218_vm6 = vcmask 1040384   ;;  %vm220_vm7 = vcmask 458752   ;;  %s473_s22 = smov [#allocation13]  }
  0x6c   :  { %v168_v14 = vadd.f32 %v166_v6, %v150_v2  ;;  %v172_v15 = vadd.f32 %v170_v7, %v152_v3  ;;  %v108_v16 = vld [vmem:[#allocation6] sm:$0xff]  ;;  %v109_v17 = vld [vmem:[#allocation6 + $0x8] sm:$0xff]  ;;  %v110_v18 = vld [vmem:[#allocation6 + $0x10] sm:$0xff]  ;;  %s281_s23 = sshll.u32 %s473_s22, 4  ;;  %vm273_vm8 = vcmask 0   ;;  %s282_s23 = int_to_ptr.vmem [resolvable:$true] %s281_s23 }
  0x6d   :  { %v111_v19 = vld [vmem:[#allocation6 + $0x18] sm:$0xff]  ;;  %v112_v20 = vld [vmem:[#allocation6 + $0x20] sm:$0xff]  ;;  %v113_v21 = vld [vmem:[#allocation6 + $0x28] sm:$0xff]  ;;  %v114_v22 = vsub.f32 %v102_v8, %v108_v16  ;;  %v115_v23 = vsub.f32 %v103_v9, %v109_v17  ;;  %v116_v24 = vsub.f32 %v104_v10, %v110_v18  ;;  %v198_v8 = vlaneseq  ;;  %s433_s1 = scalar_lea.vmem %s282_s23, 16  ;;  %s437_s26 = scalar_lea.vmem %s282_s23, 32 }
  0x6e   :  { %v174_v25 = vmul.f32 %v172_v15, %v168_v14  ;;  %v117_v26 = vsub.f32 %v105_v11, %v111_v19  ;;  %v119_v27 = vsub.f32 %v107_v13, %v113_v21  ;;  %v599_v28 = vld [vmem:[#allocation8 + $0x4] ss:$2 sm:$0x3]  ;;  %v118_v29 = vsub.f32 %v106_v12, %v112_v20  ;;  %v601_v33 = vld [vmem:[#allocation9 + $0x4] ss:$2 sm:$0x3]  ;;  %p434_p3 = scmp.ne.s32.totalorder %s282_s23, %s433_s1  ;;  %p438_p4 = scmp.lt.s32.totalorder %s282_s23, %s282_s23 }
  0x6f   :  { %v120_v30 = vmul.f32 %v114_v22, %v114_v22  ;;  %v121_v31 = vmul.f32 %v115_v23, %v115_v23  ;;  %v122_v32 = vmul.f32 %v116_v24, %v116_v24  ;;  %v603_v34 = vld [vmem:[#allocation8 + $0x5] ss:$2 sm:$0x3]  ;;  %v161_v35 = vld [vmem:[#allocation9 + $0x5] ss:$2 sm:$0x3]  ;;  %v151_v43 = vmul.f32 %v599_v28, %v599_v28  ;;  %p439_p5 = scmp.lt.s32.totalorder %s437_s26, %s433_s1 }
  0x70   :  { %303 = vrsqrt.f32 %v174_v25  ;;  %v241_v36 = vld [vmem:[#allocation11] sm:$0xff]  ;;  %v243_v37 = vld [vmem:[%s646_s5] sm:$0xff]  ;;  %v123_v38 = vmul.f32 %v117_v26, %v117_v26  ;;  %v242_v40 = vld [vmem:[#allocation11 + $0x8] sm:$0xff]  ;;  %v125_v42 = vmul.f32 %v119_v27, %v119_v27  ;;  %v153_v44 = vmul.f32 %v601_v33, %v601_v33  ;;  %s270_s21 = smul.f32 0.2, %s293_s19 }
  0x71   :  { %v126_v39 = vadd.f32 %v121_v31, %v120_v30  ;;  %v244_v41 = vld [vmem:[%s646_s5 + $0x8] sm:$0xff]  ;;  %v167_v45 = vmul.f32 %v603_v34, %v603_v34  ;;  %v124_v46 = vmul.f32 %v118_v29, %v118_v29  ;;  %v171_v48 = vmul.f32 %v161_v35, %v161_v35  ;;  %s261_s5 = sld [smem:[#allocation12]]  ;;  %p440_p6 = por %p439_p5, %p438_p4 }
  0x72   :  { %v245_v49 = vsub.f32 %v241_v36, %v243_v37  ;;  %v246_v51 = vsub.f32 %v242_v40, %v244_v41  ;;  %v131_v54 = vsel %vm130_vm0, %v125_v42, 0.0  ;;  %vm178_vm2 = vcmp.eq.f32.partialorder %v174_v25, inf }
  0x73   :  { %v127_v47 = vadd.f32 %v126_v39, %v122_v32  ;;  %v169_v50 = vadd.f32 %v167_v45, %v151_v43  ;;  %v173_v53 = vadd.f32 %v171_v48, %v153_v44  ;;  %v181_v62 = vand.u32 2147483648, %v174_v25  ;;  %p441_p7 = pnand %p440_p6, %p434_p3 }
  0x74   :  { %v248_v55 = vmul.f32 %v246_v51, %v246_v51  ;;  %v247_v58 = vmul.f32 %v245_v49, %v245_v49  ;;  %vm180_vm3 = vcmp.eq.f32.partialorder %v174_v25, 0.0  ;;  %v148_v11 = vmul.f32 %v585_v1, %v583_v0 }
  0x75   :  { %v128_v52 = vadd.f32 %v127_v47, %v123_v38  ;;  %v175_v57 = vmul.f32 %v173_v53, %v169_v50  ;;  %v162_v12 = vmul.f32 %v593_v5, %v591_v4  ;;  %v199_v14 = vshrl.u32 %v198_v8, 7 }
  0x76   :  { %v250_v59 = vsel %vm249_vm1, %v248_v55, 0.0  ;;  %v149_v0 = vmul.f32 %v601_v33, %v599_v28  ;;  %v163_v1 = vmul.f32 %v161_v35, %v603_v34  ;;  %v271_v8 = vstv %s270_s21 }
  0x77   :  { %v129_v56 = vadd.f32 %v128_v52, %v124_v46  ;;  %305 = vrsqrt.f32 %v175_v57  ;;  %v251_v2 = vadd.f32 %v250_v59, %v247_v58  ;;  %vm185_vm4 = vcmp.eq.f32.partialorder %v175_v57, inf  ;;  %s267_s20 = smul.f32 0.2, %s261_s5 }
  0x78   :  { %v188_v10 = vand.u32 2147483648, %v175_v57  ;;  %vm187_vm5 = vcmp.eq.f32.partialorder %v175_v57, 0.0  ;;  %v164_v17 = vadd.f32 %v162_v12, %v148_v11  ;;  %v200_v19 = vsub.s32 0, %v199_v14 }
  0x79   :  { %v132_v60 = vadd.f32 %v131_v54, %v129_v56  ;;  %v204_v20 = vsub.s32 1, %v199_v14  ;;  %v165_v26 = vadd.f32 %v163_v1, %v149_v0 }
  0x7a   :  { %v304_v61 = vpop.eup %303 }
  0x7b   :  { %v177_v63 = vmul.f32 %v304_v61, %v174_v25  ;;  %133 = vadd.xlane.f32.xlu1 %v132_v60 }
  0x7d   :  { %v179_v3 = vsel %vm178_vm2, %v174_v25, %v177_v63 }
  0x7e   :  { %v182_v6 = vsel %vm180_vm3, %v181_v62, %v179_v3 }
  0x7f   :  { %v190_v7 = vmax.f32 %v182_v6, 1e-08  ;;  %252 = vadd.xlane.f32.xlu1 %v251_v2  ;;  %v268_v6 = vstv %s267_s20 }
  0x81   :  { %307 = vrcp.f32 %v190_v7  ;;  %v306_v9 = vpop.eup %305 }
  0x82   :  { %v184_v13 = vmul.f32 %v306_v9, %v175_v57 }
  0x84   :  { %v186_v15 = vsel %vm185_vm4, %v175_v57, %v184_v13 }
  0x85   :  { %v189_v16 = vsel %vm187_vm5, %v188_v10, %v186_v15 }
  0x86   :  { %v191_v18 = vmax.f32 %v189_v16, 1e-08 }
  0x88   :  { %309 = vrcp.f32 %v191_v18 }
  0x8b   :  { %v308_v21 = vpop.eup %307 }
  0x8c   :  { %v193_v22 = vmul.f32 %v308_v21, %v164_v17 }
  0x8e   :  { %v201_v4 = vrot.slane %v193_v22, %v200_v19  ;;  %v205_v5 = vrot.slane %v193_v22, %v204_v20 }
  0x90   :  { %v219_v23 = vsel %vm218_vm6, %v201_v4, 0.0  ;;  %v221_v24 = vsel %vm220_vm7, %v205_v5, 0.0 }
  0x91   :  { %v222_v25 = vadd.f32 %v221_v24, %v219_v23 }
  0x92   :  { %v310_v27 = vpop.eup %309 }
  0x93   :  { %223 = vadd.xlane.f32.xlu0 %v222_v25  ;;  %v195_v29 = vmul.f32 %v310_v27, %v165_v26 }
  0x95   :  { %v209_v30 = vrot.slane %v195_v29, %v200_v19  ;;  %v213_v31 = vrot.slane %v195_v29, %v204_v20 }
  0x97   :  { %v225_v32 = vsel %vm218_vm6, %v209_v30, 0.0  ;;  %v226_v36 = vsel %vm220_vm7, %v213_v31, 0.0 }
  0x98   :  { %v227_v37 = vadd.f32 %v226_v36, %v225_v32 }
  0x9a   :  { %228 = vadd.xlane.f32.xlu0 %v227_v37 }
 0x108   :  { %v134_v28 = vpop.xlane.xlu1 %133 }
 0x109   :  { %v135_v38 = vrot.slane %v134_v28, 4 }
 0x10b   :  { %v136_v40 = vadd.f32 %v135_v38, %v134_v28 }
 0x10c   :  { %v253_v33 = vpop.xlane.xlu1 %252 }
 0x10d   :  { %v254_v35 = vrot.slane %v253_v33, 4  ;;  %v137_v46 = vrot.slane %v136_v40, 2 }
 0x10f   :  { %v255_v39 = vadd.f32 %v254_v35, %v253_v33  ;;  %v138_v50 = vadd.f32 %v137_v46, %v136_v40 }
 0x111   :  { %v256_v45 = vrot.slane %v255_v39, 2  ;;  %v139_v54 = vrot.slane %v138_v50, 1 }
 0x113   :  { %v257_v49 = vadd.f32 %v256_v45, %v255_v39  ;;  %v140_v58 = vadd.f32 %v139_v54, %v138_v50 }
 0x115   :  { %v258_v53 = vrot.slane %v257_v49, 1  ;;  %v141_v62 = vmul.f32 0.00018168605, %v140_v58 }
 0x117   :  { %v259_v57 = vadd.f32 %v258_v53, %v257_v49 }
 0x119   :  { %v260_v61 = vmul.f32 0.00058139535, %v259_v57 }
 0x11b   :  { %v265_v2 = vmul.f32 0.3, %v260_v61 }
 0x120   :  { %v224_v34 = vpop.xlane.xlu0 %223 }
 0x121   :  { %v230_v42 = vsel %vm218_vm6, %v224_v34, 0.0 }
 0x127   :  { %v229_v41 = vpop.xlane.xlu0 %228 }
 0x128   :  { %v231_v43 = vsel %vm218_vm6, %v229_v41, 0.0 }
 0x129   :  { %v232_v44 = vadd.f32 %v231_v43, %v230_v42 }
 0x12b   :  { %v233_v47 = vrot.slane %v232_v44, 4 }
 0x12d   :  { %v234_v48 = vadd.f32 %v233_v47, %v232_v44 }
 0x12f   :  { %v235_v51 = vrot.slane %v234_v48, 2 }
 0x131   :  { %v236_v52 = vadd.f32 %v235_v51, %v234_v48 }
 0x133   :  { %v237_v55 = vrot.slane %v236_v52, 1 }
 0x135   :  { %v238_v56 = vadd.f32 %v237_v55, %v236_v52 }
 0x137   :  { %v239_v59 = vmul.f32 0.0027027028, %v238_v56 }
 0x139   :  { %v240_v60 = vsub.f32 1.0, %v239_v59 }
 0x13b   :  { %v263_v63 = vmul.f32 0.3, %v240_v60 }
 0x13d   :  { %v264_v3 = vadd.f32 %v263_v63, %v141_v62 }
 0x13f   :  { %v266_v7 = vadd.f32 %v265_v2, %v264_v3 }
 0x141   :  { %v269_v9 = vadd.f32 %v268_v6, %v266_v7 }
 0x143   :  { %v272_v10 = vadd.f32 %v271_v8, %v269_v9 }
 0x145   :  { %274 = vst.msk [vmem:[#allocation13] sm:$0x1] %vm273_vm8, %v272_v10 }
 0x146   :  { %444 = shalt.err (!%p441_p7)
}
 0x147   :  { %s445_s27 = scalar_lea.hbm %s648_s7, 16 }
 0x148   :  { %p446_p8 = scmp.ne.s32.totalorder %s648_s7, %s445_s27  ;;  %p449_p9 = scmp.lt.u32.totalorder %s445_s27, %s648_s7 }
 0x14a   :  { %p451_p10 = pnand %p449_p9, %p446_p8 }
 0x14c   :  { %454 = shalt.err (!%p451_p10)
}
 0x14d   :  { %284 = dma.vmem_to_hbm [thread:$0]  %s282_s23, 16, %s648_s7, [#allocation4]  }
 0x14e   :  { %463 = dma.done.wait [#allocation4], 16  }
 0x14f   :  { %464 = vsyncadd [#allocation4], 4294967280 }
 0x150   :  { %288 = vsyncpa [#allocation3], 1 }
 0x151   :  { %289 = vsyncpa [#allocation7], 1 }
 0x152   :  { %290 = vsyncpa [#allocation10], 1 }
 0x153   :  { %291 = vsyncpa [#allocation4], 1 }
 0x154   :  { %292 = vsyncpa [#allocation5], 1 }

</bundles_post_ra>
